<compile_context>
chip_gen: v5e
topology: v5e:2x2
jax: 0.10.0
libtpu: 0.0.40
codegen_flags: <defaults>
</compile_context>

<pallas_src>
import math
from functools import partial

import numpy as np
import jax
import jax.numpy as jnp
from jax import lax
from jax.experimental import pallas as pl
from jax.experimental.pallas import tpu as pltpu


_RID_BITS = 6
_RID_MASK = (1 << _RID_BITS) - 1    # 63; real rating buckets are 0..9, pad slot = 63


def _round_up(x, m):
    return (x + m - 1) // m * m


def _split3_bf16(x):
    """3-way bf16 split of an f32 array: hi + mid + lo == x to ~2^-27 relative."""
    x = jnp.asarray(x, jnp.float32)
    hi = x.astype(jnp.bfloat16).astype(jnp.float32)
    r1 = x - hi
    mid = r1.astype(jnp.bfloat16).astype(jnp.float32)
    lo = (r1 - mid).astype(jnp.bfloat16).astype(jnp.float32)
    return hi, mid, lo


def _features_embedding_kernel(pk_ref, iid_ref, wu_ref, wi_ref, out_ref, *, kf):
    NL = pk_ref.shape[0]            # TB * L (flattened user x slot)
    Ku, N6 = wu_ref.shape           # fused [feature | rating] table, N6 = 3 * 2D
    D2 = N6 // 3                    # 2 * D
    D = D2 // 2
    Ki = wi_ref.shape[0]
    TB, OUT_W = out_ref.shape
    L = NL // TB

    packed = pk_ref[...]                          # (NL, 1) int32
    rid = jnp.bitwise_and(packed, _RID_MASK)      # rating bucket (pad slots: 63)
    fid = jnp.right_shift(packed, _RID_BITS)      # feature id

    # Two-hot row per slot: a 1 at column `fid` (feature block) and a 1 at
    # column `kf + rid` (rating block).  Pad slots have rid=63 -> kf+63 >= Ku,
    # so their rating half is all-zero and the fe*re product vanishes — no mask
    # tensor and no O(NL*Kf) select needed.  {0,1} is exact in bf16.
    iota_u = lax.broadcasted_iota(jnp.int32, (NL, Ku), 1)
    oh_u = jnp.logical_or(iota_u == fid, iota_u == rid + kf).astype(jnp.bfloat16)

    # Single native-bf16 MXU pass (f32 accumulate) against the fused
    # block-diagonal table with hi/mid/lo splits along N; reconstruct in f32.
    s = jnp.dot(oh_u, wu_ref[...], preferred_element_type=jnp.float32)   # (NL, 6D)
    fe_re = s[:, 0:D2] + s[:, D2:2 * D2] + s[:, 2 * D2:3 * D2]           # (NL, 2D)
    prod = fe_re[:, 0:D] * fe_re[:, D:D2]                                # (NL, D)
    # per-user segment sum; L is a multiple of 8 so this reshape is tile-aligned.
    user = prod.reshape(TB, L, D).sum(axis=1)                            # (TB, D)

    # Item lookup: one-hot bf16 matmul against the hi/mid/lo-split item table.
    iid = iid_ref[...]                                                   # (TB, 1)
    iota_i = lax.broadcasted_iota(jnp.int32, (TB, Ki), 1)
    oh_i = (iota_i == iid).astype(jnp.bfloat16)
    si = jnp.dot(oh_i, wi_ref[...], preferred_element_type=jnp.float32)  # (TB, 3D)
    item = si[:, 0:D] + si[:, D:2 * D] + si[:, 2 * D:3 * D]              # (TB, D)

    # Lane-dense full-block store: [user | item | zero pad to OUT_W lanes].
    parts = [user, item]
    if OUT_W > D2:
        parts.append(jnp.zeros((TB, OUT_W - D2), jnp.float32))
    out_ref[...] = jnp.concatenate(parts, axis=-1)


def features_embedding_forward(feature_ids, feature_ratings, item_ids,
                               feat_tab, rating_tab, item_tab, *, tile_b=256):
    """feature_ids / feature_ratings: lists (len B) of 1-D ragged arrays."""
    B = len(feature_ids)
    D = feat_tab.shape[1]
    D2 = 2 * D

    # Static slots per user: power of two >= 8 (keeps the in-kernel
    # (NL, D) -> (TB, L, D) reshape tile-aligned, limits recompiles).
    max_len = max((int(len(f)) for f in feature_ids), default=1)
    L = max(8, 1 << (max(max_len, 1) - 1).bit_length())

    # Batch tiling: >=2 grid steps when the batch allows (v7x has 2 TensorCores),
    # TB ~ B / n_steps so padded fake users stay bounded.
    B8 = _round_up(B, 8)
    n_steps = max(1, -(-B8 // tile_b))
    if B8 >= 16:
        n_steps = max(n_steps, 2)
    TB = _round_up(-(-B8 // n_steps), 8)
    Bp = _round_up(B, TB)

    # Host packing: feature id and rating bucket share one int32 per slot
    # (1 DMA stream instead of 3); pad slots get rid=63 (out of rating range).
    pk = np.full((Bp * L, 1), _RID_MASK, np.int32)
    iid = np.zeros((Bp, 1), np.int32)
    for b, (f, r) in enumerate(zip(feature_ids, feature_ratings)):
        f = np.asarray(f, np.int32)
        r = np.asarray(r, np.float32)
        n = f.shape[0]
        rid = ((r - 0.5) * 2.0).astype(np.int32)   # mirrors the PyTorch .int() truncation
        pk[b * L:b * L + n, 0] = (f << _RID_BITS) | rid
    iid[:B, 0] = np.asarray(item_ids, np.int32)

    # Fused block-diagonal [feature | rating] table and item table, each with
    # hi/mid/lo bf16 splits laid out along the N dimension (3 column blocks).
    nf, nr, ni = feat_tab.shape[0], rating_tab.shape[0], item_tab.shape[0]
    Kf, Kr, Ki = _round_up(nf, 8), _round_up(nr, 8), _round_up(ni, 8)
    assert Kr <= _RID_MASK, "rating table too large for the packed rid field"
    Ku = Kf + Kr
    wu = jnp.zeros((Ku, 3 * D2), jnp.float32)
    wi = jnp.zeros((Ki, 3 * D), jnp.float32)
    fsplit = _split3_bf16(feat_tab)
    rsplit = _split3_bf16(rating_tab)
    isplit = _split3_bf16(item_tab)
    for s in range(3):
        wu = wu.at[:nf, s * D2:s * D2 + D].set(fsplit[s])
        wu = wu.at[Kf:Kf + nr, s * D2 + D:s * D2 + D2].set(rsplit[s])
        wi = wi.at[:ni, s * D:(s + 1) * D].set(isplit[s])
    wu = wu.astype(jnp.bfloat16)   # split values are bf16-representable -> exact cast
    wi = wi.astype(jnp.bfloat16)

    OUT_W = _round_up(D2, 128)     # lane-dense output rows -> unmasked full stores

    grid = (Bp // TB,)
    kernel = partial(_features_embedding_kernel, kf=Kf)
    out = pl.pallas_call(
        kernel,
        grid=grid,
        in_specs=[
            pl.BlockSpec((TB * L, 1), lambda i: (i, 0)),   # packed feature/rating ids
            pl.BlockSpec((TB, 1), lambda i: (i, 0)),       # item ids
            # Constant-index tables (fetched once, VMEM-resident at these sizes).
            # TODO(synk): production tables -> HBM-resident (pl.ANY) gather path
            # and/or single-buffered table specs; critical under v7x's 64 MiB VMEM.
            pl.BlockSpec((Ku, 3 * D2), lambda i: (0, 0)),
            pl.BlockSpec((Ki, 3 * D), lambda i: (0, 0)),
        ],
        out_specs=pl.BlockSpec((TB, OUT_W), lambda i: (i, 0)),
        out_shape=jax.ShapeDtypeStruct((Bp, OUT_W), jnp.float32),
        compiler_params=pltpu.CompilerParams(
            dimension_semantics=("parallel",),
            # Raise vmem_limit_bytes here once tables + (NL, Ku) one-hots approach
            # the scoped VMEM default (16 MiB v5e / 32 MiB v6e, v7x).
        ),
    )(pk, iid, wu, wi)

    # (Bp, OUT_W) slab -> (B, 2, D), matching torch.stack((user, item), dim=1)
    return out[:B, :D2].reshape(B, 2, D)


def reference_forward(feature_ids, feature_ratings, item_ids,
                      feat_tab, rating_tab, item_tab):
    users = []
    for fids, rts in zip(feature_ids, feature_ratings):
        ridx = ((jnp.asarray(rts, jnp.float32) - 0.5) * 2.0).astype(jnp.int32)
        emb = feat_tab[jnp.asarray(fids, jnp.int32)] * rating_tab[ridx]
        users.append(emb.sum(axis=0))
    user = jnp.stack(users)
    item = item_tab[jnp.asarray(item_ids, jnp.int32)]
    return jnp.stack((user, item), axis=1)


def xavier_uniform(key, shape):
    fan_out, fan_in = shape  # matches torch's fan calc for 2-D weights
    bound = math.sqrt(6.0 / (fan_in + fan_out))
    return jax.random.uniform(key, shape, jnp.float32, -bound, bound)


if __name__ == "__main__":
    num_items = 32
    embed_dim = 32
    B = 4

    key = jax.random.PRNGKey(0)
    k_feat, k_rate, k_item, k_ids, k_rts, k_iid = jax.random.split(key, 6)

    # Parameters (deterministic xavier-uniform init, like the module's __init__).
    feat_tab = xavier_uniform(k_feat, (num_items + 1, embed_dim))
    rating_tab = xavier_uniform(k_rate, (10, embed_dim))
    item_tab = xavier_uniform(k_item, (num_items, embed_dim))

    # Ragged per-user feature lists (variable lengths), ratings in {0.5,...,5.0}.
    lengths = [5, 3, 8, 6]
    id_keys = jax.random.split(k_ids, B)
    rt_keys = jax.random.split(k_rts, B)
    feature_ids = [jax.random.randint(id_keys[i], (lengths[i],), 0, num_items + 1)
                   for i in range(B)]
    feature_ratings = [0.5 * jax.random.randint(rt_keys[i], (lengths[i],), 1, 11).astype(jnp.float32)
                       for i in range(B)]
    item_ids = jax.random.randint(k_iid, (B,), 0, num_items)

    out = features_embedding_forward(feature_ids, feature_ratings, item_ids,
                                     feat_tab, rating_tab, item_tab)
    out = jax.block_until_ready(out)

    ref = reference_forward(feature_ids, feature_ratings, item_ids,
                            feat_tab, rating_tab, item_tab)
    assert out.shape == (B, 2, embed_dim)
    assert jnp.allclose(out, ref, atol=1e-5, rtol=1e-5), "mismatch vs. reference"
    print("KERNEL_OK")
</pallas_src>

<mosaic_0001>
module attributes {stable_mosaic.version = 11 : i64} {
  func.func @_features_embedding_kernel(%arg0: i32, %arg1: memref<64x1xi32, #tpu.memory_space<vmem>>, %arg2: memref<8x1xi32, #tpu.memory_space<vmem>>, %arg3: memref<56x192xbf16, #tpu.memory_space<vmem>>, %arg4: memref<32x96xbf16, #tpu.memory_space<vmem>>, %arg5: memref<8x128xf32, #tpu.memory_space<vmem>>) attributes {dimension_semantics = [#tpu.dimension_semantics<parallel>], iteration_bounds = array<i64: 1>, scalar_prefetch = 0 : i64, scratch_operands = 0 : i64, tpu.core_type = #tpu.core_type<tc>, window_params = [{transform_indices = @transform_0, window_bounds = array<i64: 64, 1>}, {transform_indices = @transform_1, window_bounds = array<i64: 8, 1>}, {pipeline_mode = #tpu.pipeline_mode<synchronous>, transform_indices = @transform_2, window_bounds = array<i64: 56, 192>}, {pipeline_mode = #tpu.pipeline_mode<synchronous>, transform_indices = @transform_3, window_bounds = array<i64: 32, 96>}, {transform_indices = @transform_4, window_bounds = array<i64: 8, 128>}]} {
    %c0 = arith.constant 0 : index
    %c0_0 = arith.constant 0 : index
    %0 = vector.load %arg1[%c0, %c0_0] : memref<64x1xi32, #tpu.memory_space<vmem>>, vector<64x1xi32>
    %c63_i32 = arith.constant 63 : i32
    %1 = vector.broadcast %c63_i32 : i32 to vector<64x1xi32>
    %2 = arith.andi %0, %1 : vector<64x1xi32>
    %c6_i32 = arith.constant 6 : i32
    %3 = vector.broadcast %c6_i32 : i32 to vector<64x1xi32>
    %4 = arith.shrsi %0, %3 : vector<64x1xi32>
    %5 = tpu.iota {dimensions = array<i32: 1>} : vector<64x56xi32>
    %6 = vector.broadcast %4 : vector<64x1xi32> to vector<64x56xi32>
    %7 = arith.cmpi eq, %5, %6 : vector<64x56xi32>
    %c40_i32 = arith.constant 40 : i32
    %8 = vector.broadcast %c40_i32 : i32 to vector<64x1xi32>
    %9 = arith.addi %2, %8 : vector<64x1xi32>
    %10 = vector.broadcast %9 : vector<64x1xi32> to vector<64x56xi32>
    %11 = arith.cmpi eq, %5, %10 : vector<64x56xi32>
    %12 = arith.ori %7, %11 : vector<64x56xi1>
    %13 = arith.extui %12 : vector<64x56xi1> to vector<64x56xi32>
    %14 = arith.sitofp %13 : vector<64x56xi32> to vector<64x56xf32>
    %15 = arith.truncf %14 : vector<64x56xf32> to vector<64x56xbf16>
    %c0_1 = arith.constant 0 : index
    %c0_2 = arith.constant 0 : index
    %16 = vector.load %arg3[%c0_1, %c0_2] : memref<56x192xbf16, #tpu.memory_space<vmem>>, vector<56x192xbf16>
    %cst = arith.constant dense<0.000000e+00> : vector<64x192xf32>
    %17 = tpu.matmul %15, %16, %cst {dimension_numbers = #tpu.dot_dimension_numbers<[1], [0], [0], [1], [0, 0, 1, 1], [], []>} : vector<64x56xbf16>, vector<56x192xbf16>, vector<64x192xf32> -> vector<64x192xf32>
    %18 = vector.extract_strided_slice %17 {offsets = [0, 0], sizes = [64, 64], strides = [1, 1]} : vector<64x192xf32> to vector<64x64xf32>
    %19 = vector.extract_strided_slice %17 {offsets = [0, 64], sizes = [64, 64], strides = [1, 1]} : vector<64x192xf32> to vector<64x64xf32>
    %20 = arith.addf %18, %19 : vector<64x64xf32>
    %21 = vector.extract_strided_slice %17 {offsets = [0, 128], sizes = [64, 64], strides = [1, 1]} : vector<64x192xf32> to vector<64x64xf32>
    %22 = arith.addf %20, %21 : vector<64x64xf32>
    %23 = vector.extract_strided_slice %22 {offsets = [0, 0], sizes = [64, 32], strides = [1, 1]} : vector<64x64xf32> to vector<64x32xf32>
    %24 = vector.extract_strided_slice %22 {offsets = [0, 32], sizes = [64, 32], strides = [1, 1]} : vector<64x64xf32> to vector<64x32xf32>
    %25 = arith.mulf %23, %24 : vector<64x32xf32>
    %26 = vector.shape_cast %25 : vector<64x32xf32> to vector<8x8x32xf32>
    %cst_3 = arith.constant dense<0.000000e+00> : vector<8x32xf32>
    %27 = vector.multi_reduction <add>, %26, %cst_3 [1] : vector<8x8x32xf32> to vector<8x32xf32>
    %c0_4 = arith.constant 0 : index
    %c0_5 = arith.constant 0 : index
    %28 = vector.load %arg2[%c0_4, %c0_5] : memref<8x1xi32, #tpu.memory_space<vmem>>, vector<8x1xi32>
    %29 = tpu.iota {dimensions = array<i32: 1>} : vector<8x32xi32>
    %30 = vector.broadcast %28 : vector<8x1xi32> to vector<8x32xi32>
    %31 = arith.cmpi eq, %29, %30 : vector<8x32xi32>
    %32 = arith.extui %31 : vector<8x32xi1> to vector<8x32xi32>
    %33 = arith.sitofp %32 : vector<8x32xi32> to vector<8x32xf32>
    %34 = arith.truncf %33 : vector<8x32xf32> to vector<8x32xbf16>
    %c0_6 = arith.constant 0 : index
    %c0_7 = arith.constant 0 : index
    %35 = vector.load %arg4[%c0_6, %c0_7] : memref<32x96xbf16, #tpu.memory_space<vmem>>, vector<32x96xbf16>
    %cst_8 = arith.constant dense<0.000000e+00> : vector<8x96xf32>
    %36 = tpu.matmul %34, %35, %cst_8 {dimension_numbers = #tpu.dot_dimension_numbers<[1], [0], [0], [1], [0, 0, 1, 1], [], []>} : vector<8x32xbf16>, vector<32x96xbf16>, vector<8x96xf32> -> vector<8x96xf32>
    %37 = vector.extract_strided_slice %36 {offsets = [0, 0], sizes = [8, 32], strides = [1, 1]} : vector<8x96xf32> to vector<8x32xf32>
    %38 = vector.extract_strided_slice %36 {offsets = [0, 32], sizes = [8, 32], strides = [1, 1]} : vector<8x96xf32> to vector<8x32xf32>
    %39 = arith.addf %37, %38 : vector<8x32xf32>
    %40 = vector.extract_strided_slice %36 {offsets = [0, 64], sizes = [8, 32], strides = [1, 1]} : vector<8x96xf32> to vector<8x32xf32>
    %41 = arith.addf %39, %40 : vector<8x32xf32>
    %cst_9 = arith.constant 0.000000e+00 : f32
    %42 = vector.broadcast %cst_9 : f32 to vector<8x64xf32>
    %43 = tpu.concatenate %27, %41, %42 in 1 : vector<8x32xf32>, vector<8x32xf32>, vector<8x64xf32> -> vector<8x128xf32>
    %c0_10 = arith.constant 0 : index
    %c0_11 = arith.constant 0 : index
    %44 = vector.load %arg5[%c0_10, %c0_11] : memref<8x128xf32, #tpu.memory_space<vmem>>, vector<8x128xf32>
    tpu.vector_store %arg5[%c0_10, %c0_11], %43 {strides = array<i32>} : memref<8x128xf32, #tpu.memory_space<vmem>>, vector<8x128xf32>,
    return
  }
  func.func @transform_0(%arg0: i32) -> (i32, i32) {
    %c0_i32 = arith.constant 0 : i32
    %c0_i32_0 = arith.constant 0 : i32
    return %arg0, %c0_i32 : i32, i32
  }
  func.func @transform_1(%arg0: i32) -> (i32, i32) {
    %c0_i32 = arith.constant 0 : i32
    %c0_i32_0 = arith.constant 0 : i32
    return %arg0, %c0_i32 : i32, i32
  }
  func.func @transform_2(%arg0: i32) -> (i32, i32) {
    %c0_i32 = arith.constant 0 : i32
    %c0_i32_0 = arith.constant 0 : i32
    %c0_i32_1 = arith.constant 0 : i32
    return %c0_i32, %c0_i32_0 : i32, i32
  }
  func.func @transform_3(%arg0: i32) -> (i32, i32) {
    %c0_i32 = arith.constant 0 : i32
    %c0_i32_0 = arith.constant 0 : i32
    %c0_i32_1 = arith.constant 0 : i32
    return %c0_i32, %c0_i32_0 : i32, i32
  }
  func.func @transform_4(%arg0: i32) -> (i32, i32) {
    %c0_i32 = arith.constant 0 : i32
    %c0_i32_0 = arith.constant 0 : i32
    return %arg0, %c0_i32 : i32, i32
  }
}

</mosaic_0001>

<bundles_post_ra>
// kernel: tpu_custom_call.1
= control target key start
LH: loop header
LB: loop body
LE: loop exit
PB: predicated region body
PF: predicated region fallthrough
CT: control target
= control target key end

     0   :  { %v607_v2 = vmov 0   ;;  %s761_s0 = inlined_call_operand.vmem [shape: s32[64,1], index: 0, kind: input, shape index: {}]   ;;  %s762_s1 = inlined_call_operand.vmem [shape: s32[8,1], index: 1, kind: input, shape index: {}]   ;;  %s763_s2 = inlined_call_operand.vmem [shape: bf16[56,192], index: 2, kind: input, shape index: {}]   ;;  %s764_s3 = inlined_call_operand.vmem [shape: bf16[32,96], index: 3, kind: input, shape index: {}]   ;;  %s765_s4 = inlined_call_operand.hbm [shape: f32[8,128], index: 4, kind: output, shape index: {}]  }
   0x1   :  { %v21_v0 = vld [vmem:[%s761_s0 + $0x10] sm:$0xff]  ;;  %v23_v1 = vld [vmem:[%s761_s0 + $0x20] sm:$0xff]  ;;  %578 = vset.pattern.permute.xlu0 %v607_v2  ;;  %579 = vset.pattern.permute.xlu1 %v607_v2  ;;  %v22_v6 = vld [vmem:[%s761_s0 + $0x18] sm:$0xff] }
   0x2   :  { %v37_v3 = vshra.s32 %v21_v0, 6  ;;  %v29_v4 = vand.u32 63, %v21_v0  ;;  %v39_v5 = vshra.s32 %v23_v1, 6  ;;  %580 = vset.pattern.permute.xlu2 %v607_v2  ;;  %v24_v8 = vld [vmem:[%s761_s0 + $0x28] sm:$0xff] }
   0x4   :  { %52 = vperm.xlu0 %578, %v37_v3   ;;  %v79_v7 = vadd.s32 40, %v29_v4  ;;  %58 = vperm.xlu2 %580, %v39_v5  }
   0x5   :  { %9 = vsyncpa [#allocation3], 0  ;;  %v30_v9 = vand.u32 63, %v22_v6  ;;  %v38_v10 = vshra.s32 %v22_v6, 6  ;;  %v40_v11 = vshra.s32 %v24_v8, 6  ;;  %v31_v13 = vand.u32 63, %v23_v1 }
   0x6   :  { %92 = vperm.xlu1 %579, %v79_v7   ;;  %v19_v14 = vld [vmem:[%s761_s0] sm:$0xff]  ;;  %v32_v15 = vand.u32 63, %v24_v8  ;;  %v20_v19 = vld [vmem:[%s761_s0 + $0x8] sm:$0xff]  ;;  %v26_v20 = vld [vmem:[%s761_s0 + $0x38] sm:$0xff]  ;;  %vm200_vm0 = vcmask 1043456   ;;  %v43_v56 = vlaneseq  ;;  %v608_v3 = vmov 0.0  }
   0x7   :  { %v80_v12 = vadd.s32 40, %v30_v9  ;;  %v81_v16 = vadd.s32 40, %v31_v13  ;;  %v35_v17 = vshra.s32 %v19_v14, 6  ;;  %v25_v21 = vld [vmem:[%s761_s0 + $0x30] sm:$0xff]  ;;  %v36_v22 = vshra.s32 %v20_v19, 6  ;;  %v410_v33 = vld [vmem:[%s762_s1] sm:$0xff] }
   0x8   :  { %v82_v18 = vadd.s32 40, %v32_v15  ;;  %v42_v23 = vshra.s32 %v26_v20, 6  ;;  %v41_v24 = vshra.s32 %v25_v21, 6  ;;  %v27_v25 = vand.u32 63, %v19_v14  ;;  %v151_v34 = vld [vmem:[%s763_s2 + $0x30] sm:$0xff]  ;;  %v563_v9 = vld [vmem:[%s764_s3 + $0x8] sm:$0xff] }
   0x9   :  { %v33_v26 = vand.u32 63, %v25_v21  ;;  %v28_v27 = vand.u32 63, %v20_v19  ;;  %v34_v31 = vand.u32 63, %v26_v20  ;;  %v171_v35 = vunpack.c.l.b16 %v151_v34  ;;  %v532_v38 = vld [vmem:[%s763_s2 + $0x20] sm:$0xf]  ;;  %s610_s7 = smov 96  }
   0xa   :  { %v77_v28 = vadd.s32 40, %v27_v25  ;;  %v561_v39 = vld [vmem:[%s763_s2 + $0x24] sm:$0xf0]  ;;  %v524_v41 = vld [vmem:[%s763_s2 + $0x10] sm:$0xf]  ;;  %v172_v47 = vunpack.c.h.b16 %v151_v34  ;;  %v706_v62 = vand.u32 127, %v43_v56 }
   0xb   :  { %v83_v29 = vadd.s32 40, %v33_v26  ;;  %v78_v30 = vadd.s32 40, %v28_v27  ;;  %v84_v32 = vadd.s32 40, %v34_v31  ;;  %v179_v36 = vpack.c.b16 %v171_v35, %v171_v35  ;;  %v559_v42 = vld [vmem:[%s763_s2 + $0x14] sm:$0xf0]  ;;  %s611_s8 = smov 32  }
   0xc   :  { %55 = vperm.xlu0 %578, %v38_v10   ;;  %61 = vperm.xlu2 %580, %v40_v11   ;;  %v533_v40 = vor.u32 %v561_v39, %v532_v38  ;;  %v525_v43 = vor.u32 %v559_v42, %v524_v41  ;;  %v516_v44 = vld [vmem:[%s763_s2] sm:$0xf]  ;;  %v557_v45 = vld [vmem:[%s763_s2 + $0x4] sm:$0xf0]  ;;  %v180_v48 = vpack.c.b16 %v172_v47, %v172_v47  ;;  %v560_v50 = vld [vmem:[%s763_s2 + $0x24] sm:$0xf] }
   0xd   :  { %v202_v37 = vsel %vm200_vm0, %v179_v36, 0  ;;  %v517_v46 = vor.u32 %v557_v45, %v516_v44  ;;  %v534_v51 = vld [vmem:[%s763_s2 + $0x28] sm:$0xf0]  ;;  %v558_v54 = vld [vmem:[%s763_s2 + $0x14] sm:$0xf]  ;;  %vm187_vm7 = vcmask 457728  }
   0xe   :  { %95 = vperm.xlu1 %579, %v80_v12   ;;  %564 = vmatpush.bf16.msra.mxu3 %v202_v37  ;;  %v205_v49 = vsel %vm200_vm0, %v180_v48, 0  ;;  %v537_v52 = vor.u32 %v560_v50, %v534_v51  ;;  %v526_v55 = vld [vmem:[%s763_s2 + $0x18] sm:$0xf0]  ;;  %v556_v60 = vld [vmem:[%s763_s2 + $0x4] sm:$0xf]  ;;  %s612_s9 = smov [#allocation2]  }
   0xf   :  { %211 = vmatpush.bf16.msra.mxu0 %v202_v37  ;;  %240 = vmatpush.bf16.msra.mxu1 %v205_v49  ;;  %v529_v57 = vor.u32 %v558_v54, %v526_v55  ;;  %v518_v61 = vld [vmem:[%s763_s2 + $0x8] sm:$0xf0]  ;;  %v562_v12 = vld [vmem:[%s764_s3] sm:$0xff]  ;;  %s609_s3 = smov 64   ;;  %s495_s10 = sshll.u32 %s612_s9, 4  ;;  %s496_s10 = int_to_ptr.vmem [resolvable:$true] %s495_s10 }
  0x10   :  { %568 = vmatpush.bf16.msra.mxu2 %v205_v49  ;;  %v521_v63 = vor.u32 %v556_v60, %v518_v61  ;;  %s497_s12 = sshll.u32 %s765_s4, 4  ;;  %s498_s12 = int_to_ptr.hbm [resolvable:$true] %s497_s12 }
  0x12   :  { %565 = vmatpush.bf16.msra.mxu3 %v533_v40 }
  0x13   :  { %212 = vmatpush.bf16.msra.mxu0 %v533_v40  ;;  %241 = vmatpush.bf16.msra.mxu1 %v537_v52 }
  0x14   :  { %98 = vperm.xlu0 %578, %v81_v16   ;;  %46 = vperm.xlu2 %580, %v35_v17  }
  0x15   :  { %569 = vmatpush.bf16.msra.mxu2 %v537_v52 }
  0x16   :  { %101 = vperm.xlu1 %579, %v82_v18   ;;  %566 = vmatpush.bf16.msra.mxu3 %v525_v43 }
  0x17   :  { %213 = vmatpush.bf16.msra.mxu0 %v525_v43  ;;  %242 = vmatpush.bf16.msra.mxu1 %v529_v57 }
  0x19   :  { %570 = vmatpush.bf16.msra.mxu2 %v529_v57 }
  0x1a   :  { %567 = vmatpush.bf16.msra.mxu3 %v517_v46 }
  0x1b   :  { %214 = vmatpush.bf16.msra.mxu0 %v517_v46  ;;  %243 = vmatpush.bf16.msra.mxu1 %v521_v63 }
  0x1c   :  { %49 = vperm.xlu0 %578, %v36_v22   ;;  %67 = vperm.xlu2 %580, %v42_v23  }
  0x1d   :  { %571 = vmatpush.bf16.msra.mxu2 %v521_v63 }
  0x1e   :  { %64 = vperm.xlu1 %579, %v41_v24  }
  0x21   :  { %443 = vmatpush.bf16.msrb.mxu2 %v563_v9 }
  0x24   :  { %86 = vperm.xlu0 %578, %v77_v28   ;;  %104 = vperm.xlu2 %580, %v83_v29  }
  0x25   :  { %444 = vmatpush.bf16.msrb.mxu2 %v562_v12 }
  0x26   :  { %89 = vperm.xlu1 %579, %v78_v30  }
  0x2c   :  { %107 = vperm.xlu0 %578, %v84_v32  }
  0x2e   :  { %412 = vperm.xlu1 %579, %v410_v33  }
  0x5e   :  { %v59_v53 = vpop.permute.xlu2 %58 }
  0x5f   :  { %vm73_vm12 = vcmp.eq.s32.totalorder %v706_v62, %v59_v53 }
  0x66   :  { %v62_v0 = vpop.permute.xlu2 %61 }
  0x67   :  { %vm74_vm9 = vcmp.eq.s32.totalorder %v706_v62, %v62_v0 }
  0x6e   :  { %v47_v7 = vpop.permute.xlu2 %46 }
  0x6f   :  { %vm69_vm14 = vcmp.eq.s32.totalorder %v706_v62, %v47_v7 }
  0x76   :  { %v53_v58 = vpop.permute.xlu0 %52  ;;  %v68_v13 = vpop.permute.xlu2 %67 }
  0x77   :  { %vm71_vm1 = vcmp.eq.s32.totalorder %v706_v62, %v53_v58 }
  0x78   :  { %v93_v59 = vpop.permute.xlu1 %92 }
  0x79   :  { %vm111_vm2 = vcmp.eq.s32.totalorder %v706_v62, %v93_v59 }
  0x7a   :  { %vm119_vm3 = vmor %vm71_vm1, %vm111_vm2 }
  0x7b   :  { %v508_v4 = vsel %vm119_vm3, 1.0, %v608_v3 }
  0x7e   :  { %v56_v1 = vpop.permute.xlu0 %55  ;;  %v105_v20 = vpop.permute.xlu2 %104 }
  0x7f   :  { %vm72_vm4 = vcmp.eq.s32.totalorder %v706_v62, %v56_v1 }
  0x80   :  { %v96_v2 = vpop.permute.xlu1 %95 }
  0x81   :  { %vm112_vm5 = vcmp.eq.s32.totalorder %v706_v62, %v96_v2 }
  0x82   :  { %vm120_vm6 = vmor %vm72_vm4, %vm112_vm5  ;;  %vm115_vm5 = vcmp.eq.s32.totalorder %v706_v62, %v105_v20 }
  0x83   :  { %v509_v5 = vsel %vm120_vm6, 1.0, %v608_v3 }
  0x84   :  { %v142_v6 = vpack.c.bf16 %v509_v5, %v508_v4 }
  0x86   :  { %v99_v8 = vpop.permute.xlu0 %98  ;;  %539 = vmatmul.msk.bf16.vlgmr.msra.gmra.mxu3 %vm187_vm7, %v142_v6 }
  0x87   :  { %vm113_vm10 = vcmp.eq.s32.totalorder %v706_v62, %v99_v8 }
  0x88   :  { %v102_v10 = vpop.permute.xlu1 %101  ;;  %vm121_vm13 = vmor %vm73_vm12, %vm113_vm10  ;;  %vm353_vm12 = vcmask 261120  }
  0x89   :  { %vm114_vm8 = vcmp.eq.s32.totalorder %v706_v62, %v102_v10  ;;  %v510_v16 = vsel %vm121_vm13, 1.0, %v608_v3  ;;  %vm469_vm13 = vcmask 1042434  }
  0x8a   :  { %vm122_vm11 = vmor %vm74_vm9, %vm114_vm8  ;;  %vm76_vm8 = vcmp.eq.s32.totalorder %v706_v62, %v68_v13 }
  0x8b   :  { %v511_v15 = vsel %vm122_vm11, 1.0, %v608_v3 }
  0x8c   :  { %v143_v17 = vpack.c.bf16 %v511_v15, %v510_v16 }
  0x8e   :  { %v50_v11 = vpop.permute.xlu0 %49 }
  0x8f   :  { %vm70_vm1 = vcmp.eq.s32.totalorder %v706_v62, %v50_v11 }
  0x90   :  { %v65_v14 = vpop.permute.xlu1 %64 }
  0x91   :  { %vm75_vm4 = vcmp.eq.s32.totalorder %v706_v62, %v65_v14 }
  0x92   :  { %vm123_vm6 = vmor %vm75_vm4, %vm115_vm5 }
  0x93   :  { %v512_v25 = vsel %vm123_vm6, 1.0, %v608_v3 }
  0x96   :  { %540 = vmatmul.msk.bf16.gmra.mxu3 %vm187_vm7, %v143_v17  ;;  %v87_v18 = vpop.permute.xlu0 %86 }
  0x97   :  { %vm109_vm15 = vcmp.eq.s32.totalorder %v706_v62, %v87_v18 }
  0x98   :  { %vm117_vm0 = vmor %vm69_vm14, %vm109_vm15  ;;  %v90_v19 = vpop.permute.xlu1 %89  ;;  %vm471_vm14 = vcmask 1043459   ;;  %vm473_vm15 = vcmask 1044484  }
  0x99   :  { %vm110_vm2 = vcmp.eq.s32.totalorder %v706_v62, %v90_v19  ;;  %v506_v21 = vsel %vm117_vm0, 1.0, %v608_v3  ;;  %vm475_vm0 = vcmask 1045509  }
  0x9a   :  { %vm118_vm3 = vmor %vm70_vm1, %vm110_vm2  ;;  %vm477_vm1 = vcmask 1046534   ;;  %vm479_vm2 = vcmask 1047559  }
  0x9b   :  { %v507_v22 = vsel %vm118_vm3, 1.0, %v608_v3  ;;  %vm487_vm3 = vcmask 523264  }
  0x9c   :  { %v141_v23 = vpack.c.bf16 %v507_v22, %v506_v21 }
  0x9e   :  { %538 = vmatmul.msk.bf16.vlgmr.msra.gmra.mxu0 %vm187_vm7, %v141_v23  ;;  %542 = vmatmul.msk.bf16.vlgmr.msra.gmra.mxu1 %vm187_vm7, %v141_v23  ;;  %v108_v24 = vpop.permute.xlu0 %107 }
  0x9f   :  { %vm116_vm9 = vcmp.eq.s32.totalorder %v706_v62, %v108_v24 }
  0xa0   :  { %vm124_vm10 = vmor %vm76_vm8, %vm116_vm9  ;;  %v413_v28 = vpop.permute.xlu1 %412 }
  0xa1   :  { %v513_v26 = vsel %vm124_vm10, 1.0, %v608_v3  ;;  %vm414_vm11 = vcmp.eq.s32.totalorder %v706_v62, %v413_v28 }
  0xa2   :  { %v144_v27 = vpack.c.bf16 %v513_v26, %v512_v25  ;;  %v546_v29 = vsel %vm414_vm11, 1.0, %v608_v3 }
  0xa3   :  { %v417_v30 = vpack.c.bf16 %v546_v29, %v546_v29 }
  0xa4   :  { %545 = vmatmul.msk.bf16.vlgmr.msra.gmra.mxu2 %vm187_vm7, %v144_v27 }
  0xa6   :  { %541 = vmatmul.msk.bf16.gmra.mxu3 %vm187_vm7, %v144_v27 }
  0xae   :  { %543 = vmatmul.msk.bf16.gmra.mxu1 %vm187_vm7, %v142_v6 }
  0xb4   :  { %555 = vmatmul.msk.bf16.vlgmr.msrb.gmra.mxu2 %vm353_vm12, %v417_v30 }
  0xbe   :  { %544 = vmatmul.msk.bf16.gmra.mxu1 %vm187_vm7, %v143_v17  ;;  %vm467_vm7 = vcmask 1041409  }
 0x109   :  { %v221_v31 = vpop.f32.mrf.mxu3 }
 0x10a   :  { %277 = vrot.lane.b32.xlu1 %v221_v31, %s609_s3 }
 0x111   :  { %v223_v32 = vpop.f32.mrf.mxu3 }
 0x119   :  { %v226_v33 = vpop.f32.mrf.mxu3 }
 0x11b   :  { %v216_v34 = vpop.f32.mrf.mxu0  ;;  %v245_v43 = vpop.f32.mrf.mxu1 }
 0x11c   :  { %273 = vrot.lane.b32.xlu2 %v216_v34, %s609_s3 }
 0x121   :  { %v228_v35 = vpop.f32.mrf.mxu3 }
 0x122   :  { %283 = vrot.lane.b32.xlu1 %v228_v35, %s609_s3 }
 0x123   :  { %v218_v36 = vpop.f32.mrf.mxu0  ;;  %v247_v44 = vpop.f32.mrf.mxu1 }
 0x124   :  { %279 = vrot.lane.b32.xlu2 %v223_v32, %s609_s3  ;;  %275 = vrot.lane.b32.xlu0 %v218_v36, %s609_s3 }
 0x127   :  { %v260_v37 = vpop.f32.mrf.mxu2 }
 0x129   :  { %v231_v38 = vpop.f32.mrf.mxu3 }
 0x12b   :  { %v250_v45 = vpop.f32.mrf.mxu1 }
 0x12c   :  { %281 = vrot.lane.b32.xlu0 %v226_v33, %s609_s3  ;;  %285 = vrot.lane.b32.xlu2 %v231_v38, %s609_s3 }
 0x12f   :  { %v262_v39 = vpop.f32.mrf.mxu2 }
 0x131   :  { %v233_v40 = vpop.f32.mrf.mxu3 }
 0x133   :  { %v252_v54 = vpop.f32.mrf.mxu1 }
 0x134   :  { %287 = vrot.lane.b32.xlu0 %v233_v40, %s609_s3 }
 0x137   :  { %v446_v41 = vpop.f32.mrf.mxu2 }
 0x138   :  { %451 = vrot.lane.b32.xlu1 %v446_v41, %s610_s7  ;;  %455 = vrot.lane.b32.xlu2 %v446_v41, %s609_s3 }
 0x13b   :  { %v255_v59 = vpop.f32.mrf.mxu1 }
 0x13f   :  { %v448_v42 = vpop.f32.mrf.mxu2 }
 0x143   :  { %v257_v62 = vpop.f32.mrf.mxu1 }
 0x176   :  { %v274_v46 = vpop.permute.xlu2 %273 }
 0x177   :  { %v297_v47 = vadd.f32 %v274_v46, %v216_v34 }
 0x179   :  { %v305_v48 = vadd.f32 %v297_v47, %v245_v43 }
 0x17b   :  { %321 = vrot.lane.b32.xlu0 %v305_v48, %s610_s7 }
 0x17c   :  { %v278_v49 = vpop.permute.xlu1 %277 }
 0x17d   :  { %v299_v50 = vadd.f32 %v278_v49, %v221_v31 }
 0x17e   :  { %v280_v51 = vpop.permute.xlu2 %279 }
 0x17f   :  { %v307_v52 = vadd.f32 %v299_v50, %v250_v45  ;;  %v300_v53 = vadd.f32 %v280_v51, %v223_v32 }
 0x181   :  { %v308_v55 = vadd.f32 %v300_v53, %v252_v54  ;;  %325 = vrot.lane.b32.xlu2 %v307_v52, %s610_s7 }
 0x183   :  { %327 = vrot.lane.b32.xlu0 %v308_v55, %s610_s7 }
 0x186   :  { %v286_v56 = vpop.permute.xlu2 %285 }
 0x187   :  { %v303_v57 = vadd.f32 %v286_v56, %v231_v38 }
 0x189   :  { %v311_v58 = vadd.f32 %v303_v57, %v260_v37 }
 0x18b   :  { %333 = vrot.lane.b32.xlu0 %v311_v58, %s610_s7 }
 0x192   :  { %v456_v11 = vpop.permute.xlu2 %455 }
 0x194   :  { %v284_v60 = vpop.permute.xlu1 %283 }
 0x195   :  { %v302_v61 = vadd.f32 %v284_v60, %v228_v35 }
 0x196   :  { %v276_v63 = vpop.permute.xlu0 %275 }
 0x197   :  { %v310_v0 = vadd.f32 %v302_v61, %v257_v62  ;;  %v298_v1 = vadd.f32 %v276_v63, %v218_v36 }
 0x199   :  { %v306_v2 = vadd.f32 %v298_v1, %v247_v44  ;;  %331 = vrot.lane.b32.xlu2 %v310_v0, %s610_s7 }
 0x19b   :  { %323 = vrot.lane.b32.xlu1 %v306_v2, %s610_s7 }
 0x19e   :  { %v282_v3 = vpop.permute.xlu0 %281 }
 0x19f   :  { %v301_v4 = vadd.f32 %v282_v3, %v226_v33 }
 0x1a1   :  { %v309_v5 = vadd.f32 %v301_v4, %v255_v59 }
 0x1a3   :  { %329 = vrot.lane.b32.xlu1 %v309_v5, %s610_s7 }
 0x1a6   :  { %v288_v6 = vpop.permute.xlu0 %287 }
 0x1a7   :  { %v304_v7 = vadd.f32 %v288_v6, %v233_v40 }
 0x1a9   :  { %v312_v8 = vadd.f32 %v304_v7, %v262_v39 }
 0x1aa   :  { %v452_v9 = vpop.permute.xlu1 %451 }
 0x1ab   :  { %v454_v10 = vadd.f32 %v452_v9, %v446_v41  ;;  %335 = vrot.lane.b32.xlu1 %v312_v8, %s610_s7 }
 0x1ad   :  { %v458_v12 = vadd.f32 %v456_v11, %v454_v10 }
 0x1af   :  { %483 = vrot.lane.b32.xlu2 %v458_v12, %s611_s8 }
 0x1db   :  { %v326_v14 = vpop.permute.xlu2 %325 }
 0x1dc   :  { %v347_v17 = vmul.f32 %v326_v14, %v307_v52 }
 0x1de   :  { %v368_v20 = vsel %vm353_vm12, %v347_v17, 0.0 }
 0x1df   :  { %v369_v23 = vrot.slane %v368_v20, 4 }
 0x1e1   :  { %v370_v32 = vadd.f32 %v369_v23, %v368_v20 }
 0x1e3   :  { %v371_v41 = vrot.slane %v370_v32, 2 }
 0x1e5   :  { %v372_v50 = vadd.f32 %v371_v41, %v370_v32 }
 0x1e7   :  { %v373_v60 = vrot.slane %v372_v50, 1 }
 0x1e9   :  { %v374_v6 = vadd.f32 %v373_v60, %v372_v50 }
 0x1ed   :  { %v322_v13 = vpop.permute.xlu0 %321 }
 0x1ee   :  { %v345_v15 = vmul.f32 %v322_v13, %v305_v48 }
 0x1f0   :  { %v354_v18 = vsel %vm353_vm12, %v345_v15, 0.0 }
 0x1f1   :  { %v355_v21 = vrot.slane %v354_v18, 4 }
 0x1f3   :  { %v332_v22 = vpop.permute.xlu2 %331  ;;  %v356_v27 = vadd.f32 %v355_v21, %v354_v18 }
 0x1f4   :  { %v350_v24 = vmul.f32 %v332_v22, %v310_v0 }
 0x1f5   :  { %v328_v16 = vpop.permute.xlu0 %327  ;;  %v357_v35 = vrot.slane %v356_v27, 2 }
 0x1f6   :  { %v348_v19 = vmul.f32 %v328_v16, %v308_v55  ;;  %v389_v33 = vsel %vm353_vm12, %v350_v24, 0.0 }
 0x1f7   :  { %v390_v37 = vrot.slane %v389_v33, 4  ;;  %v358_v42 = vadd.f32 %v357_v35, %v356_v27 }
 0x1f8   :  { %v375_v25 = vsel %vm353_vm12, %v348_v19, 0.0 }
 0x1f9   :  { %v376_v30 = vrot.slane %v375_v25, 4  ;;  %v391_v47 = vadd.f32 %v390_v37, %v389_v33  ;;  %v359_v52 = vrot.slane %v358_v42, 1 }
 0x1fb   :  { %v377_v38 = vadd.f32 %v376_v30, %v375_v25  ;;  %v392_v56 = vrot.slane %v391_v47, 2  ;;  %v360_v61 = vadd.f32 %v359_v52, %v358_v42 }
 0x1fd   :  { %v334_v26 = vpop.permute.xlu0 %333  ;;  %v378_v48 = vrot.slane %v377_v38, 2 }
 0x1fe   :  { %v351_v31 = vmul.f32 %v334_v26, %v311_v58 }
 0x1ff   :  { %v379_v57 = vadd.f32 %v378_v48, %v377_v38 }
 0x200   :  { %v396_v39 = vsel %vm353_vm12, %v351_v31, 0.0 }
 0x201   :  { %v397_v45 = vrot.slane %v396_v39, 4  ;;  %v380_v3 = vrot.slane %v379_v57, 1 }
 0x203   :  { %v398_v55 = vadd.f32 %v397_v45, %v396_v39  ;;  %v381_v14 = vadd.f32 %v380_v3, %v379_v57 }
 0x205   :  { %v399_v0 = vrot.slane %v398_v55, 2 }
 0x207   :  { %v400_v11 = vadd.f32 %v399_v0, %v398_v55 }
 0x209   :  { %v484_v27 = vpop.permute.xlu2 %483 }
 0x20d   :  { %v324_v28 = vpop.permute.xlu1 %323 }
 0x20e   :  { %v346_v29 = vmul.f32 %v324_v28, %v306_v2  ;;  %v393_v2 = vadd.f32 %v392_v56, %v391_v47 }
 0x210   :  { %v361_v34 = vsel %vm353_vm12, %v346_v29, 0.0  ;;  %v394_v13 = vrot.slane %v393_v2, 1 }
 0x211   :  { %v362_v36 = vrot.slane %v361_v34, 4 }
 0x212   :  { %v395_v20 = vadd.f32 %v394_v13, %v393_v2 }
 0x213   :  { %v363_v40 = vadd.f32 %v362_v36, %v361_v34 }
 0x215   :  { %v364_v43 = vrot.slane %v363_v40, 2  ;;  %v330_v44 = vpop.permute.xlu1 %329 }
 0x216   :  { %v349_v46 = vmul.f32 %v330_v44, %v309_v5 }
 0x217   :  { %v365_v49 = vadd.f32 %v364_v43, %v363_v40 }
 0x218   :  { %v382_v51 = vsel %vm353_vm12, %v349_v46, 0.0 }
 0x219   :  { %v366_v53 = vrot.slane %v365_v49, 1  ;;  %v383_v54 = vrot.slane %v382_v51, 4 }
 0x21b   :  { %v367_v58 = vadd.f32 %v366_v53, %v365_v49  ;;  %v384_v59 = vadd.f32 %v383_v54, %v382_v51 }
 0x21d   :  { %v385_v62 = vrot.slane %v384_v59, 2  ;;  %v336_v63 = vpop.permute.xlu1 %335  ;;  %v468_v4 = vsel %vm467_vm7, %v367_v58, %v360_v61 }
 0x21e   :  { %v352_v1 = vmul.f32 %v336_v63, %v312_v8  ;;  %v470_v12 = vsel %vm469_vm13, %v374_v6, %v468_v4  ;;  %v401_v8 = vrot.slane %v400_v11, 1 }
 0x21f   :  { %v386_v5 = vadd.f32 %v385_v62, %v384_v59  ;;  %v472_v17 = vsel %vm471_vm14, %v381_v14, %v470_v12 }
 0x220   :  { %v403_v7 = vsel %vm353_vm12, %v352_v1, 0.0  ;;  %v402_v24 = vadd.f32 %v401_v8, %v400_v11 }
 0x221   :  { %v387_v9 = vrot.slane %v386_v5, 1  ;;  %v404_v10 = vrot.slane %v403_v7, 4 }
 0x223   :  { %v388_v15 = vadd.f32 %v387_v9, %v386_v5  ;;  %v405_v16 = vadd.f32 %v404_v10, %v403_v7 }
 0x225   :  { %v406_v18 = vrot.slane %v405_v16, 2  ;;  %v474_v19 = vsel %vm473_vm15, %v388_v15, %v472_v17 }
 0x226   :  { %v476_v23 = vsel %vm475_vm0, %v395_v20, %v474_v19 }
 0x227   :  { %v407_v21 = vadd.f32 %v406_v18, %v405_v16  ;;  %v478_v26 = vsel %vm477_vm1, %v402_v24, %v476_v23 }
 0x229   :  { %v408_v22 = vrot.slane %v407_v21, 1 }
 0x22b   :  { %v409_v25 = vadd.f32 %v408_v22, %v407_v21 }
 0x22d   :  { %v480_v28 = vsel %vm479_vm2, %v409_v25, %v478_v26 }
 0x22e   :  { %v486_v29 = vsel %vm353_vm12, %v480_v28, %v484_v27 }
 0x22f   :  { %v488_v30 = vsel %vm487_vm3, %v486_v29, 0.0 }
 0x230   :  { %489 = vst [vmem:[#allocation2] sm:$0xff] %v488_v30 }
 0x231   :  { %500 = dma.vmem_to_hbm [thread:$0]  %s496_s10, 128, %s498_s12, [#allocation3]  }
 0x232   :  { %605 = dma.done.wait [#allocation3], 128  }
 0x233   :  { %606 = vsyncadd [#allocation3], 4294967168 }
 0x234   :  { %505 = vsyncpa [#allocation3], 1 }

</bundles_post_ra>
